<compile_context>
chip_gen: v6e
topology: v6e:2x2x1
jax: 0.10.0
libtpu: 0.0.40
codegen_flags: <defaults>
</compile_context>

<pallas_src>
import jax
import jax.numpy as jnp
from jax.experimental import pallas as pl
from jax.experimental.pallas import tpu as pltpu

INPUT_SIZE = 6
IN_PAD = 8            # contraction dim of layer 1, padded to the sublane tile
HIDDEN1 = 256
HIDDEN2 = 128
HIDDEN3 = 64
BN_EPS = 1e-5
TILE_GRAN = 128       # batch-tile granularity (keeps bf16 sublane packing aligned)


def _round_up(n, m):
    return ((n + m - 1) // m) * m


def _mlp_kernel(x_ref,
                w1_ref, b1_ref,
                w2_ref, b2_ref,
                w3_ref, b3_ref,
                w4_ref, b4_ref,
                o_ref):
    """(TB, 8) bf16 activation tile -> (TB, 1) f32 output tile.

    Layers 1-3: bf16 operands, f32 accumulation. Layer 4 (64->1) stays f32.
    """
    h = jnp.dot(x_ref[...], w1_ref[...], preferred_element_type=jnp.float32) + b1_ref[...]
    h = jnp.maximum(h, 0.0).astype(jnp.bfloat16)
    h = jnp.dot(h, w2_ref[...], preferred_element_type=jnp.float32) + b2_ref[...]
    h = jnp.maximum(h, 0.0).astype(jnp.bfloat16)
    h = jnp.dot(h, w3_ref[...], preferred_element_type=jnp.float32) + b3_ref[...]
    h = jnp.maximum(h, 0.0)   # keep f32 for the final f32 layer
    o_ref[...] = jnp.dot(h, w4_ref[...], preferred_element_type=jnp.float32) + b4_ref[...]


def _fold_bn(gamma, beta, running_mean, running_var, eps=BN_EPS):
    """Inference-mode BatchNorm1d -> per-feature (scale, shift) vectors of shape (C,)."""
    scale = gamma / jnp.sqrt(running_var + eps)
    shift = beta - running_mean * scale
    return scale, shift


def init_params(key):
    """Deterministic synthetic parameters matching MovieModel's shapes (raw, unfolded)."""
    ks = jax.random.split(key, 12)
    p = {}
    dims = [(INPUT_SIZE, HIDDEN1), (HIDDEN1, HIDDEN2), (HIDDEN2, HIDDEN3), (HIDDEN3, 1)]
    for i, (din, dout) in enumerate(dims, start=1):
        # nn.Linear weight is (out, in); we store transposed (in, out) for h @ W.
        p[f"w{i}"] = (jax.random.normal(ks[2 * i - 2], (din, dout), jnp.float32)
                      * (1.0 / jnp.sqrt(din)))
        p[f"b{i}"] = jax.random.normal(ks[2 * i - 1], (1, dout), jnp.float32) * 0.01
    bn_dims = [INPUT_SIZE, HIDDEN1, HIDDEN2, HIDDEN3]
    for i, c in enumerate(bn_dims):
        kg, kb, km, kv = jax.random.split(ks[8 + i], 4)
        gamma = 1.0 + 0.1 * jax.random.normal(kg, (c,), jnp.float32)
        beta = 0.1 * jax.random.normal(kb, (c,), jnp.float32)
        rmean = 0.1 * jax.random.normal(km, (c,), jnp.float32)
        rvar = 1.0 + 0.1 * jax.random.uniform(kv, (c,), jnp.float32)
        p[f"bn{i}_scale"], p[f"bn{i}_shift"] = _fold_bn(gamma, beta, rmean, rvar)
    return p


def fold_params(p):
    """One-time host-side precompute:
      * fold each inference-mode BN affine into the following Linear,
      * zero-pad layer-1's contraction dim 6 -> 8 (sublane alignment),
      * cast layer 1-3 weights to bf16 (f32 accumulation in-kernel); layer 4 stays f32.
    """
    fp = {}
    for i in range(1, 5):
        s = p[f"bn{i-1}_scale"]          # (in,)
        t = p[f"bn{i-1}_shift"]          # (in,)
        w = p[f"w{i}"]                   # (in, out)
        b = p[f"b{i}"]                   # (1, out)
        fp[f"w{i}"] = s[:, None] * w
        fp[f"b{i}"] = (b + t[None, :] @ w).astype(jnp.float32)
    fp["w1"] = jnp.pad(fp["w1"], ((0, IN_PAD - INPUT_SIZE), (0, 0)))
    for i in range(1, 4):
        fp[f"w{i}"] = fp[f"w{i}"].astype(jnp.bfloat16)
    # w4/b4 remain f32: (64, 1) and (1, 1).
    return fp


def movie_model_forward(x, fp, *, tb=2048):
    """x: (B, 6) f32; fp: folded params. Returns (B, 1) f32."""
    B = x.shape[0]
    # Clamp the batch tile for small batches (128-row granularity keeps bf16 packing
    # aligned and the padded garbage rows are sliced off below).
    tb = int(min(tb, _round_up(B, TILE_GRAN)))
    # Keep >=2 grid steps for medium/large batches so v7x's two TensorCores both get
    # work along the "parallel" axis (neutral on single-TC v5e/v6e).
    if B >= 256 and -(-B // tb) < 2:
        tb = _round_up(-(-B // 2), TILE_GRAN)
    b_pad = _round_up(B, tb)

    xp = jnp.pad(x, ((0, b_pad - B), (0, IN_PAD - INPUT_SIZE))).astype(jnp.bfloat16)

    batch_map = lambda i: (i, 0)   # activation / output: step along batch
    whole = lambda i: (0, 0)       # weights / biases: VMEM-resident across the grid

    in_specs = [
        pl.BlockSpec((tb, IN_PAD), batch_map),
        pl.BlockSpec((IN_PAD, HIDDEN1), whole), pl.BlockSpec((1, HIDDEN1), whole),
        pl.BlockSpec((HIDDEN1, HIDDEN2), whole), pl.BlockSpec((1, HIDDEN2), whole),
        pl.BlockSpec((HIDDEN2, HIDDEN3), whole), pl.BlockSpec((1, HIDDEN3), whole),
        pl.BlockSpec((HIDDEN3, 1), whole), pl.BlockSpec((1, 1), whole),
    ]

    out = pl.pallas_call(
        _mlp_kernel,
        out_shape=jax.ShapeDtypeStruct((b_pad, 1), jnp.float32),
        grid=(b_pad // tb,),
        in_specs=in_specs,
        out_specs=pl.BlockSpec((tb, 1), batch_map),
        compiler_params=pltpu.CompilerParams(
            dimension_semantics=("parallel",),
            vmem_limit_bytes=48 * 1024 * 1024),
    )(xp, fp["w1"], fp["b1"], fp["w2"], fp["b2"], fp["w3"], fp["b3"], fp["w4"], fp["b4"])

    return out[:B]


def reference_forward(x, p):
    """Pure-JAX f32 reference using the raw (unfolded) parameters."""
    def bn(h, i):
        return h * p[f"bn{i}_scale"][None, :] + p[f"bn{i}_shift"][None, :]
    h = bn(x, 0)
    h = jnp.maximum(h @ p["w1"] + p["b1"], 0.0)
    h = bn(h, 1)
    h = jnp.maximum(h @ p["w2"] + p["b2"], 0.0)
    h = bn(h, 2)
    h = jnp.maximum(h @ p["w3"] + p["b3"], 0.0)
    h = bn(h, 3)
    return h @ p["w4"] + p["b4"]


if __name__ == "__main__":
    key = jax.random.PRNGKey(0)
    k_params, k_x1, k_x2 = jax.random.split(key, 3)
    raw_params = init_params(k_params)
    folded = fold_params(raw_params)   # one-time host-side BN fold + padding + bf16 cast

    # Tolerances: layers 1-3 use bf16 operands (f32 accumulation), so allow ~1% error.
    ATOL = RTOL = 3e-2

    # Small batch (matches the original toy size).
    x_small = jax.random.normal(k_x1, (8, INPUT_SIZE), jnp.float32)
    out_small = jax.block_until_ready(movie_model_forward(x_small, folded))
    ref_small = reference_forward(x_small, raw_params)
    assert out_small.shape == (8, 1)
    assert jnp.allclose(out_small, ref_small, atol=ATOL, rtol=RTOL), \
        "Pallas kernel mismatch vs reference (batch=8)"

    # Larger, non-tile-multiple batch exercising batch padding + the >=2-step parallel
    # grid path (tile halving for v7x's two TensorCores).
    x_big = jax.random.normal(k_x2, (1000, INPUT_SIZE), jnp.float32)
    out_big = jax.block_until_ready(movie_model_forward(x_big, folded))
    ref_big = reference_forward(x_big, raw_params)
    assert out_big.shape == (1000, 1)
    assert jnp.allclose(out_big, ref_big, atol=ATOL, rtol=RTOL), \
        "Pallas kernel mismatch vs reference (batch=1000)"

    print("KERNEL_OK")
</pallas_src>

<mosaic_0001>
module attributes {stable_mosaic.version = 11 : i64} {
  func.func @_mlp_kernel(%arg0: i32, %arg1: memref<128x8xbf16, #tpu.memory_space<vmem>>, %arg2: memref<8x256xbf16, #tpu.memory_space<vmem>>, %arg3: memref<1x256xf32, #tpu.memory_space<vmem>>, %arg4: memref<256x128xbf16, #tpu.memory_space<vmem>>, %arg5: memref<1x128xf32, #tpu.memory_space<vmem>>, %arg6: memref<128x64xbf16, #tpu.memory_space<vmem>>, %arg7: memref<1x64xf32, #tpu.memory_space<vmem>>, %arg8: memref<64x1xf32, #tpu.memory_space<vmem>>, %arg9: memref<1x1xf32, #tpu.memory_space<vmem>>, %arg10: memref<128x1xf32, #tpu.memory_space<vmem>>) attributes {dimension_semantics = [#tpu.dimension_semantics<parallel>], iteration_bounds = array<i64: 1>, scalar_prefetch = 0 : i64, scratch_operands = 0 : i64, tpu.core_type = #tpu.core_type<tc>, window_params = [{transform_indices = @transform_0, window_bounds = array<i64: 128, 8>}, {pipeline_mode = #tpu.pipeline_mode<synchronous>, transform_indices = @transform_1, window_bounds = array<i64: 8, 256>}, {pipeline_mode = #tpu.pipeline_mode<synchronous>, transform_indices = @transform_2, window_bounds = array<i64: 1, 256>}, {pipeline_mode = #tpu.pipeline_mode<synchronous>, transform_indices = @transform_3, window_bounds = array<i64: 256, 128>}, {pipeline_mode = #tpu.pipeline_mode<synchronous>, transform_indices = @transform_4, window_bounds = array<i64: 1, 128>}, {pipeline_mode = #tpu.pipeline_mode<synchronous>, transform_indices = @transform_5, window_bounds = array<i64: 128, 64>}, {pipeline_mode = #tpu.pipeline_mode<synchronous>, transform_indices = @transform_6, window_bounds = array<i64: 1, 64>}, {pipeline_mode = #tpu.pipeline_mode<synchronous>, transform_indices = @transform_7, window_bounds = array<i64: 64, 1>}, {pipeline_mode = #tpu.pipeline_mode<synchronous>, transform_indices = @transform_8, window_bounds = array<i64: 1, 1>}, {transform_indices = @transform_9, window_bounds = array<i64: 128, 1>}]} {
    %c0 = arith.constant 0 : index
    %c0_0 = arith.constant 0 : index
    %0 = vector.load %arg1[%c0, %c0_0] : memref<128x8xbf16, #tpu.memory_space<vmem>>, vector<128x8xbf16>
    %c0_1 = arith.constant 0 : index
    %c0_2 = arith.constant 0 : index
    %1 = vector.load %arg2[%c0_1, %c0_2] : memref<8x256xbf16, #tpu.memory_space<vmem>>, vector<8x256xbf16>
    %cst = arith.constant dense<0.000000e+00> : vector<128x256xf32>
    %2 = tpu.matmul %0, %1, %cst {dimension_numbers = #tpu.dot_dimension_numbers<[1], [0], [0], [1], [0, 0, 1, 1], [], []>} : vector<128x8xbf16>, vector<8x256xbf16>, vector<128x256xf32> -> vector<128x256xf32>
    %c0_3 = arith.constant 0 : index
    %c0_4 = arith.constant 0 : index
    %3 = vector.load %arg3[%c0_3, %c0_4] : memref<1x256xf32, #tpu.memory_space<vmem>>, vector<1x256xf32>
    %4 = vector.broadcast %3 : vector<1x256xf32> to vector<128x256xf32>
    %5 = arith.addf %2, %4 : vector<128x256xf32>
    %cst_5 = arith.constant 0.000000e+00 : f32
    %6 = vector.broadcast %cst_5 : f32 to vector<128x256xf32>
    %7 = arith.maximumf %5, %6 : vector<128x256xf32>
    %8 = arith.truncf %7 : vector<128x256xf32> to vector<128x256xbf16>
    %c0_6 = arith.constant 0 : index
    %c0_7 = arith.constant 0 : index
    %9 = vector.load %arg4[%c0_6, %c0_7] : memref<256x128xbf16, #tpu.memory_space<vmem>>, vector<256x128xbf16>
    %cst_8 = arith.constant dense<0.000000e+00> : vector<128x128xf32>
    %10 = tpu.matmul %8, %9, %cst_8 {dimension_numbers = #tpu.dot_dimension_numbers<[1], [0], [0], [1], [0, 0, 1, 1], [], []>} : vector<128x256xbf16>, vector<256x128xbf16>, vector<128x128xf32> -> vector<128x128xf32>
    %c0_9 = arith.constant 0 : index
    %c0_10 = arith.constant 0 : index
    %11 = vector.load %arg5[%c0_9, %c0_10] : memref<1x128xf32, #tpu.memory_space<vmem>>, vector<1x128xf32>
    %12 = vector.broadcast %11 : vector<1x128xf32> to vector<128x128xf32>
    %13 = arith.addf %10, %12 : vector<128x128xf32>
    %cst_11 = arith.constant 0.000000e+00 : f32
    %14 = vector.broadcast %cst_11 : f32 to vector<128x128xf32>
    %15 = arith.maximumf %13, %14 : vector<128x128xf32>
    %16 = arith.truncf %15 : vector<128x128xf32> to vector<128x128xbf16>
    %c0_12 = arith.constant 0 : index
    %c0_13 = arith.constant 0 : index
    %17 = vector.load %arg6[%c0_12, %c0_13] : memref<128x64xbf16, #tpu.memory_space<vmem>>, vector<128x64xbf16>
    %cst_14 = arith.constant dense<0.000000e+00> : vector<128x64xf32>
    %18 = tpu.matmul %16, %17, %cst_14 {dimension_numbers = #tpu.dot_dimension_numbers<[1], [0], [0], [1], [0, 0, 1, 1], [], []>} : vector<128x128xbf16>, vector<128x64xbf16>, vector<128x64xf32> -> vector<128x64xf32>
    %c0_15 = arith.constant 0 : index
    %c0_16 = arith.constant 0 : index
    %19 = vector.load %arg7[%c0_15, %c0_16] : memref<1x64xf32, #tpu.memory_space<vmem>>, vector<1x64xf32>
    %20 = vector.broadcast %19 : vector<1x64xf32> to vector<128x64xf32>
    %21 = arith.addf %18, %20 : vector<128x64xf32>
    %cst_17 = arith.constant 0.000000e+00 : f32
    %22 = vector.broadcast %cst_17 : f32 to vector<128x64xf32>
    %23 = arith.maximumf %21, %22 : vector<128x64xf32>
    %c0_18 = arith.constant 0 : index
    %c0_19 = arith.constant 0 : index
    %24 = vector.load %arg8[%c0_18, %c0_19] : memref<64x1xf32, #tpu.memory_space<vmem>>, vector<64x1xf32>
    %cst_20 = arith.constant dense<0.000000e+00> : vector<128x1xf32>
    %25 = tpu.matmul %23, %24, %cst_20 {dimension_numbers = #tpu.dot_dimension_numbers<[1], [0], [0], [1], [0, 0, 1, 1], [], []>} : vector<128x64xf32>, vector<64x1xf32>, vector<128x1xf32> -> vector<128x1xf32>
    %c0_21 = arith.constant 0 : index
    %c0_22 = arith.constant 0 : index
    %26 = vector.load %arg9[%c0_21, %c0_22] : memref<1x1xf32, #tpu.memory_space<vmem>>, vector<1x1xf32>
    %27 = vector.broadcast %26 : vector<1x1xf32> to vector<128x1xf32>
    %28 = arith.addf %25, %27 : vector<128x1xf32>
    %c0_23 = arith.constant 0 : index
    %c0_24 = arith.constant 0 : index
    %29 = vector.load %arg10[%c0_23, %c0_24] : memref<128x1xf32, #tpu.memory_space<vmem>>, vector<128x1xf32>
    tpu.vector_store %arg10[%c0_23, %c0_24], %28 {strides = array<i32>} : memref<128x1xf32, #tpu.memory_space<vmem>>, vector<128x1xf32>,
    return
  }
  func.func @transform_0(%arg0: i32) -> (i32, i32) {
    %c0_i32 = arith.constant 0 : i32
    %c0_i32_0 = arith.constant 0 : i32
    return %arg0, %c0_i32 : i32, i32
  }
  func.func @transform_1(%arg0: i32) -> (i32, i32) {
    %c0_i32 = arith.constant 0 : i32
    %c0_i32_0 = arith.constant 0 : i32
    %c0_i32_1 = arith.constant 0 : i32
    return %c0_i32, %c0_i32_0 : i32, i32
  }
  func.func @transform_2(%arg0: i32) -> (i32, i32) {
    %c0_i32 = arith.constant 0 : i32
    %c0_i32_0 = arith.constant 0 : i32
    %c0_i32_1 = arith.constant 0 : i32
    return %c0_i32, %c0_i32_0 : i32, i32
  }
  func.func @transform_3(%arg0: i32) -> (i32, i32) {
    %c0_i32 = arith.constant 0 : i32
    %c0_i32_0 = arith.constant 0 : i32
    %c0_i32_1 = arith.constant 0 : i32
    return %c0_i32, %c0_i32_0 : i32, i32
  }
  func.func @transform_4(%arg0: i32) -> (i32, i32) {
    %c0_i32 = arith.constant 0 : i32
    %c0_i32_0 = arith.constant 0 : i32
    %c0_i32_1 = arith.constant 0 : i32
    return %c0_i32, %c0_i32_0 : i32, i32
  }
  func.func @transform_5(%arg0: i32) -> (i32, i32) {
    %c0_i32 = arith.constant 0 : i32
    %c0_i32_0 = arith.constant 0 : i32
    %c0_i32_1 = arith.constant 0 : i32
    return %c0_i32, %c0_i32_0 : i32, i32
  }
  func.func @transform_6(%arg0: i32) -> (i32, i32) {
    %c0_i32 = arith.constant 0 : i32
    %c0_i32_0 = arith.constant 0 : i32
    %c0_i32_1 = arith.constant 0 : i32
    return %c0_i32, %c0_i32_0 : i32, i32
  }
  func.func @transform_7(%arg0: i32) -> (i32, i32) {
    %c0_i32 = arith.constant 0 : i32
    %c0_i32_0 = arith.constant 0 : i32
    %c0_i32_1 = arith.constant 0 : i32
    return %c0_i32, %c0_i32_0 : i32, i32
  }
  func.func @transform_8(%arg0: i32) -> (i32, i32) {
    %c0_i32 = arith.constant 0 : i32
    %c0_i32_0 = arith.constant 0 : i32
    %c0_i32_1 = arith.constant 0 : i32
    return %c0_i32, %c0_i32_0 : i32, i32
  }
  func.func @transform_9(%arg0: i32) -> (i32, i32) {
    %c0_i32 = arith.constant 0 : i32
    %c0_i32_0 = arith.constant 0 : i32
    return %arg0, %c0_i32 : i32, i32
  }
}

</mosaic_0001>

<bundles_post_ra>
// kernel: tpu_custom_call.1
= control target key start
LH: loop header
LB: loop body
LE: loop exit
PB: predicated region body
PF: predicated region fallthrough
CT: control target
= control target key end

     0   :  { %vm134_vm0 = vcmask 1043456   ;;  %v1261_v1 = vmov 0   ;;  %vm109_vm1 = vcmask 64512   ;;  %v54_v32 = vlaneseq  ;;  %s1589_s1 = inlined_call_operand.vmem [shape: bf16[8,256], index: 1, kind: input, shape index: {}]   ;;  %s1590_s0 = inlined_call_operand.vmem [shape: bf16[128,8], index: 0, kind: input, shape index: {}]   ;;  %s1591_s3 = inlined_call_operand.vmem [shape: bf16[256,128], index: 3, kind: input, shape index: {}]   ;;  %s1592_s5 = inlined_call_operand.vmem [shape: bf16[128,64], index: 5, kind: input, shape index: {}]   ;;  %s1593_s2 = inlined_call_operand.vmem [shape: f32[1,256], index: 2, kind: input, shape index: {}]   ;;  %s1594_s7 = inlined_call_operand.vmem [shape: f32[64,1], index: 7, kind: input, shape index: {}]   ;;  %s1595_s4 = inlined_call_operand.vmem [shape: f32[1,128], index: 4, kind: input, shape index: {}]   ;;  %s1596_s8 = inlined_call_operand.<no memory space> [shape: f32[1,1], index: 8, kind: input, shape index: {}]   ;;  %s1597_s6 = inlined_call_operand.vmem [shape: f32[1,64], index: 6, kind: input, shape index: {}]   ;;  %s1598_s9 = inlined_call_operand.vmem [shape: f32[128,1], index: 9, kind: output, shape index: {}]  }
   0x1   :  { %v51_v0 = vld [vmem:[%s1589_s1] sm:$0xff]  ;;  %173 = vmatprep.mubr.bf16.mxu0 %v1261_v1  ;;  %v1230_v6 = vld [vmem:[%s1590_s0 + $0x8] sm:$0xff]   ;;  %v1237_v7 = vld [vmem:[%s1591_s3 + $0x78] sm:$0xff]   ;;  %vm757_vm2 = vcmask 523264   ;;  %vm951_vm3 = vcmask 7168  }
   0x2   :  { %v981_v2 = vcombine.high %v51_v0, %v51_v0  ;;  %v980_v3 = vcombine.low %v51_v0, %v51_v0  ;;  %v1229_v5 = vld [vmem:[%s1590_s0] sm:$0xff]   ;;  %v1238_v8 = vld [vmem:[%s1591_s3 + $0x38] sm:$0xff]   ;;  %1034 = vmatprep.subr.bf16.mxu1 %v1237_v7  ;;  %v1239_v9 = vld [vmem:[%s1591_s3 + $0x70] sm:$0xff]   ;;  %v55_v33 = vshrl.u32 %v54_v32, 7 }
   0x3   :  { %1035 = vmatpush3.bf16.msra.mxu1 %v1238_v8  ;;  %v1240_v10 = vld [vmem:[%s1591_s3 + $0x30] sm:$0xff]   ;;  %v1241_v11 = vld [vmem:[%s1591_s3 + $0x68] sm:$0xff]   ;;  %v1243_v13 = vld [vmem:[%s1591_s3 + $0x60] sm:$0xff]  }
   0x4   :  { %982 = vmatprep.subr.msk.bf16.mxu0 %vm134_vm0, %v981_v2  ;;  %v136_v4 = vsel %vm134_vm0, %v980_v3, 0  ;;  %1036 = vmatprep.subr.bf16.mxu1 %v1239_v9  ;;  %v1242_v12 = vld [vmem:[%s1591_s3 + $0x28] sm:$0xff]   ;;  %v1231_v14 = vld [vmem:[%s1590_s0 + $0x10] sm:$0xff]   ;;  %v1244_v15 = vld [vmem:[%s1591_s3 + $0x20] sm:$0xff]   ;;  %v60_v34 = vsub.s32 1, %v55_v33  ;;  %v56_v35 = vsub.s32 0, %v55_v33 }
   0x5   :  { %156 = vmatpush1.bf16.msra.mxu0 %v136_v4  ;;  %v1245_v16 = vld [vmem:[%s1591_s3 + $0x58] sm:$0xff]   ;;  %v1233_v19 = vld [vmem:[%s1590_s0 + $0x20] sm:$0xff]   ;;  %v1234_v20 = vld [vmem:[%s1590_s0 + $0x28] sm:$0xff]  }
   0x6   :  { %v1246_v17 = vld [vmem:[%s1591_s3 + $0x18] sm:$0xff]   ;;  %v1235_v21 = vld [vmem:[%s1590_s0 + $0x30] sm:$0xff]   ;;  %v1249_v25 = vld [vmem:[%s1591_s3 + $0x48] sm:$0xff]  }
   0x7   :  { %1037 = vmatpush3.bf16.msra.mxu1 %v1240_v10  ;;  %v1232_v18 = vld [vmem:[%s1590_s0 + $0x18] sm:$0xff]   ;;  %v1247_v23 = vld [vmem:[%s1591_s3 + $0x50] sm:$0xff]   ;;  %v1250_v26 = vld [vmem:[%s1591_s3 + $0x8] sm:$0xff]  }
   0x8   :  { %983 = vmatmul.mubr.msk.bf16.vlgmr.msra.gmra.mxu0 %vm109_vm1, %v1229_v5  ;;  %1038 = vmatprep.subr.bf16.mxu1 %v1241_v11  ;;  %v1236_v22 = vld [vmem:[%s1590_s0 + $0x38] sm:$0xff]   ;;  %v1248_v24 = vld [vmem:[%s1591_s3 + $0x10] sm:$0xff]   ;;  %v1251_v27 = vld [vmem:[%s1591_s3 + $0x40] sm:$0xff]  }
   0x9   :  { %183 = vmatprep.mubr.bf16.mxu0 %v1261_v1  ;;  %v1252_v28 = vld [vmem:[%s1591_s3] sm:$0xff]   ;;  %v1253_v29 = vld [vmem:[%s1592_s5 + $0x38] sm:$0xff]   ;;  %v1254_v30 = vld [vmem:[%s1592_s5 + $0x30] sm:$0xff]  }
   0xa   :  { %1138 = vmatprep.subr.bf16.mxu0 %v1253_v29  ;;  %v1255_v31 = vld [vmem:[%s1592_s5 + $0x28] sm:$0xff]   ;;  %v52_v36 = vld [vmem:[%s1593_s2] sm:$0x3] }
   0xb   :  { %1039 = vmatpush3.bf16.msra.mxu1 %v1242_v12  ;;  %1139 = vmatpush3.bf16.msra.mxu0 %v1253_v29  ;;  %v1407_v38 = vrot.slane %v52_v36, %v60_v34  ;;  %v1409_v39 = vrot.slane %v52_v36, %v56_v35 }
   0xc   :  { %1040 = vmatprep.subr.bf16.mxu1 %v1243_v13  ;;  %1140 = vmatprep.subr.bf16.mxu0 %v1254_v30 }
   0xf   :  { %1041 = vmatpush3.bf16.msra.mxu1 %v1244_v15  ;;  %1141 = vmatpush3.bf16.msra.mxu0 %v1254_v30 }
  0x10   :  { %984 = vmatmul.mubr.msk.bf16.gmra.mxu0 %vm109_vm1, %v1230_v6  ;;  %1042 = vmatprep.subr.bf16.mxu1 %v1245_v16 }
  0x11   :  { %193 = vmatprep.mubr.bf16.mxu0 %v1261_v1  ;;  %1142 = vmatprep.subr.bf16.mxu0 %v1255_v31 }
  0x13   :  { %1043 = vmatpush3.bf16.msra.mxu1 %v1246_v17  ;;  %1143 = vmatpush3.bf16.msra.mxu0 %v1255_v31 }
  0x14   :  { %1044 = vmatprep.subr.bf16.mxu1 %v1247_v23 }
  0x17   :  { %1045 = vmatpush3.bf16.msra.mxu1 %v1248_v24 }
  0x18   :  { %985 = vmatmul.mubr.msk.bf16.gmra.mxu0 %vm109_vm1, %v1231_v14  ;;  %1046 = vmatprep.subr.bf16.mxu1 %v1249_v25 }
  0x19   :  { %203 = vmatprep.mubr.bf16.mxu0 %v1261_v1 }
  0x1b   :  { %1047 = vmatpush3.bf16.msra.mxu1 %v1250_v26 }
  0x1c   :  { %1048 = vmatprep.subr.bf16.mxu1 %v1251_v27 }
  0x1f   :  { %1049 = vmatpush3.bf16.msra.mxu1 %v1252_v28 }
  0x20   :  { %986 = vmatmul.mubr.msk.bf16.gmra.mxu0 %vm109_vm1, %v1232_v18 }
  0x21   :  { %213 = vmatprep.mubr.bf16.mxu0 %v1261_v1 }
  0x28   :  { %987 = vmatmul.mubr.msk.bf16.gmra.mxu0 %vm109_vm1, %v1233_v19 }
  0x29   :  { %223 = vmatprep.mubr.bf16.mxu0 %v1261_v1 }
  0x30   :  { %988 = vmatmul.mubr.msk.bf16.gmra.mxu0 %vm109_vm1, %v1234_v20 }
  0x31   :  { %233 = vmatprep.mubr.bf16.mxu0 %v1261_v1 }
  0x38   :  { %989 = vmatmul.mubr.msk.bf16.gmra.mxu0 %vm109_vm1, %v1235_v21 }
  0x39   :  { %243 = vmatprep.mubr.bf16.mxu0 %v1261_v1 }
  0x40   :  { %990 = vmatmul.mubr.msk.bf16.gmra.mxu0 %vm109_vm1, %v1236_v22 }
  0xc8   :  { %v175_v37 = vpop.f32.mrf.mxu0 }
  0xc9   :  { %v176_v44 = vadd.f32 %v175_v37, %v1409_v39 }
  0xca   :  { %v177_v40 = vpop.f32.mrf.mxu0 }
  0xcb   :  { %v178_v42 = vadd.f32 %v177_v40, %v1407_v38  ;;  %v254_v51 = vmax.f32 %v176_v44, 0.0 }
  0xcc   :  { %v179_v41 = vpop.f32.mrf.mxu0 }
  0xcd   :  { %v180_v43 = vadd.f32 %v179_v41, %v1409_v39  ;;  %v255_v49 = vmax.f32 %v178_v42, 0.0 }
  0xce   :  { %v181_v45 = vpop.f32.mrf.mxu0 }
  0xcf   :  { %v182_v46 = vadd.f32 %v181_v45, %v1407_v38  ;;  %v256_v47 = vmax.f32 %v180_v43, 0.0 }
  0xd0   :  { %v185_v48 = vpop.f32.mrf.mxu0 }
  0xd1   :  { %v257_v50 = vmax.f32 %v182_v46, 0.0  ;;  %v286_v54 = vpack.c.bf16 %v256_v47, %v254_v51  ;;  %v186_v58 = vadd.f32 %v185_v48, %v1409_v39 }
  0xd2   :  { %v187_v52 = vpop.f32.mrf.mxu0 }
  0xd3   :  { %v287_v53 = vpack.c.bf16 %v257_v50, %v255_v49  ;;  %v188_v56 = vadd.f32 %v187_v52, %v1407_v38  ;;  %v258_v1 = vmax.f32 %v186_v58, 0.0 }
  0xd4   :  { %v189_v55 = vpop.f32.mrf.mxu0 }
  0xd5   :  { %v190_v57 = vadd.f32 %v189_v55, %v1409_v39  ;;  %469 = vmatprep.mubr.bf16.mxu1 %v287_v53  ;;  %v259_v63 = vmax.f32 %v188_v56, 0.0 }
  0xd6   :  { %v191_v59 = vpop.f32.mrf.mxu0  ;;  %470 = vmatmul.mubr.bf16.vlgmr.msra.gmra.mxu1 %v286_v54 }
  0xd7   :  { %v192_v60 = vadd.f32 %v191_v59, %v1407_v38  ;;  %v260_v61 = vmax.f32 %v190_v57, 0.0 }
  0xd8   :  { %v195_v62 = vpop.f32.mrf.mxu0 }
  0xd9   :  { %v261_v0 = vmax.f32 %v192_v60, 0.0  ;;  %v288_v4 = vpack.c.bf16 %v260_v61, %v258_v1  ;;  %v196_v8 = vadd.f32 %v195_v62, %v1409_v39 }
  0xda   :  { %v197_v2 = vpop.f32.mrf.mxu0 }
  0xdb   :  { %v289_v3 = vpack.c.bf16 %v261_v0, %v259_v63  ;;  %v198_v6 = vadd.f32 %v197_v2, %v1407_v38  ;;  %v262_v15 = vmax.f32 %v196_v8, 0.0 }
  0xdc   :  { %v199_v5 = vpop.f32.mrf.mxu0 }
  0xdd   :  { %v200_v7 = vadd.f32 %v199_v5, %v1409_v39  ;;  %477 = vmatprep.mubr.bf16.mxu1 %v289_v3  ;;  %v263_v13 = vmax.f32 %v198_v6, 0.0 }
  0xde   :  { %v201_v9 = vpop.f32.mrf.mxu0  ;;  %478 = vmatmul.mubr.bf16.gmra.mxu1 %v288_v4 }
  0xdf   :  { %v202_v10 = vadd.f32 %v201_v9, %v1407_v38  ;;  %v264_v11 = vmax.f32 %v200_v7, 0.0 }
  0xe0   :  { %v205_v12 = vpop.f32.mrf.mxu0 }
  0xe1   :  { %v265_v14 = vmax.f32 %v202_v10, 0.0  ;;  %v290_v18 = vpack.c.bf16 %v264_v11, %v262_v15  ;;  %v206_v22 = vadd.f32 %v205_v12, %v1409_v39 }
  0xe2   :  { %v207_v16 = vpop.f32.mrf.mxu0 }
  0xe3   :  { %v291_v17 = vpack.c.bf16 %v265_v14, %v263_v13  ;;  %v208_v20 = vadd.f32 %v207_v16, %v1407_v38  ;;  %v266_v29 = vmax.f32 %v206_v22, 0.0 }
  0xe4   :  { %v209_v19 = vpop.f32.mrf.mxu0 }
  0xe5   :  { %v210_v21 = vadd.f32 %v209_v19, %v1409_v39  ;;  %485 = vmatprep.mubr.bf16.mxu1 %v291_v17  ;;  %v267_v27 = vmax.f32 %v208_v20, 0.0 }
  0xe6   :  { %v211_v23 = vpop.f32.mrf.mxu0  ;;  %486 = vmatmul.mubr.bf16.gmra.mxu1 %v290_v18 }
  0xe7   :  { %v212_v24 = vadd.f32 %v211_v23, %v1407_v38  ;;  %v268_v25 = vmax.f32 %v210_v21, 0.0 }
  0xe8   :  { %v215_v26 = vpop.f32.mrf.mxu0 }
  0xe9   :  { %v269_v28 = vmax.f32 %v212_v24, 0.0  ;;  %v292_v32 = vpack.c.bf16 %v268_v25, %v266_v29  ;;  %v216_v36 = vadd.f32 %v215_v26, %v1409_v39  ;;  %v1256_v25 = vld [vmem:[%s1592_s5 + $0x20] sm:$0xff]   ;;  %v1259_v26 = vld [vmem:[%s1592_s5 + $0x8] sm:$0xff]   ;;  %v748_v29 = vld [vmem:[%s1594_s7 + $0x30] sm:$0xff] }
  0xea   :  { %v217_v30 = vpop.f32.mrf.mxu0  ;;  %1144 = vmatprep.subr.bf16.mxu0 %v1256_v25 }
  0xeb   :  { %v293_v31 = vpack.c.bf16 %v269_v28, %v267_v27  ;;  %v218_v34 = vadd.f32 %v217_v30, %v1407_v38  ;;  %v270_v45 = vmax.f32 %v216_v36, 0.0  ;;  %1145 = vmatpush3.bf16.msra.mxu0 %v1256_v25  ;;  %v1260_v27 = vld [vmem:[%s1592_s5] sm:$0xff]   ;;  %v749_v28 = vld [vmem:[%s1594_s7 + $0x38] sm:$0xff]  ;;  %v747_v30 = vld [vmem:[%s1594_s7 + $0x28] sm:$0xff] }
  0xec   :  { %v219_v33 = vpop.f32.mrf.mxu0  ;;  %1210 = vmatprep.subr.mxu1 %v749_v28 }
  0xed   :  { %v220_v35 = vadd.f32 %v219_v33, %v1409_v39  ;;  %493 = vmatprep.mubr.bf16.mxu1 %v293_v31  ;;  %v271_v43 = vmax.f32 %v218_v34, 0.0  ;;  %1218 = vmatpush3.msra.mxu1 %v749_v28  ;;  %v1470_v34 = vld [vmem:[%s1595_s4] ss:$0 sm:$0xff] }
  0xee   :  { %v221_v37 = vpop.f32.mrf.mxu0  ;;  %494 = vmatmul.mubr.bf16.gmra.mxu1 %v292_v32  ;;  %1211 = vmatprep.subr.mxu1 %v748_v29 }
  0xef   :  { %v222_v40 = vadd.f32 %v221_v37, %v1407_v38  ;;  %v272_v41 = vmax.f32 %v220_v35, 0.0  ;;  %1219 = vmatpush3.msra.mxu1 %v748_v29 }
  0xf0   :  { %v225_v42 = vpop.f32.mrf.mxu0  ;;  %1212 = vmatprep.subr.mxu1 %v747_v30 }
  0xf1   :  { %v273_v44 = vmax.f32 %v222_v40, 0.0  ;;  %v294_v48 = vpack.c.bf16 %v272_v41, %v270_v45  ;;  %v226_v52 = vadd.f32 %v225_v42, %v1409_v39  ;;  %1220 = vmatpush3.msra.mxu1 %v747_v30 }
  0xf2   :  { %v227_v46 = vpop.f32.mrf.mxu0 }
  0xf3   :  { %v295_v47 = vpack.c.bf16 %v273_v44, %v271_v43  ;;  %v228_v50 = vadd.f32 %v227_v46, %v1407_v38  ;;  %v274_v59 = vmax.f32 %v226_v52, 0.0 }
  0xf4   :  { %v229_v49 = vpop.f32.mrf.mxu0 }
  0xf5   :  { %v230_v51 = vadd.f32 %v229_v49, %v1409_v39  ;;  %501 = vmatprep.mubr.bf16.mxu1 %v295_v47  ;;  %v275_v57 = vmax.f32 %v228_v50, 0.0 }
  0xf6   :  { %v231_v53 = vpop.f32.mrf.mxu0  ;;  %502 = vmatmul.mubr.bf16.gmra.mxu1 %v294_v48 }
  0xf7   :  { %v232_v54 = vadd.f32 %v231_v53, %v1407_v38  ;;  %v276_v55 = vmax.f32 %v230_v51, 0.0 }
  0xf8   :  { %v235_v56 = vpop.f32.mrf.mxu0 }
  0xf9   :  { %v277_v58 = vmax.f32 %v232_v54, 0.0  ;;  %v296_v62 = vpack.c.bf16 %v276_v55, %v274_v59  ;;  %v236_v2 = vadd.f32 %v235_v56, %v1409_v39 }
  0xfa   :  { %v237_v60 = vpop.f32.mrf.mxu0 }
  0xfb   :  { %v297_v61 = vpack.c.bf16 %v277_v58, %v275_v57  ;;  %v238_v0 = vadd.f32 %v237_v60, %v1407_v38  ;;  %v278_v9 = vmax.f32 %v236_v2, 0.0 }
  0xfc   :  { %v239_v63 = vpop.f32.mrf.mxu0 }
  0xfd   :  { %v240_v1 = vadd.f32 %v239_v63, %v1409_v39  ;;  %509 = vmatprep.mubr.bf16.mxu1 %v297_v61  ;;  %v279_v7 = vmax.f32 %v238_v0, 0.0 }
  0xfe   :  { %v241_v3 = vpop.f32.mrf.mxu0  ;;  %510 = vmatmul.mubr.bf16.gmra.mxu1 %v296_v62 }
  0xff   :  { %v242_v4 = vadd.f32 %v241_v3, %v1407_v38  ;;  %v280_v5 = vmax.f32 %v240_v1, 0.0 }
 0x100   :  { %v245_v6 = vpop.f32.mrf.mxu0 }
 0x101   :  { %v281_v8 = vmax.f32 %v242_v4, 0.0  ;;  %v298_v12 = vpack.c.bf16 %v280_v5, %v278_v9  ;;  %v246_v16 = vadd.f32 %v245_v6, %v1409_v39 }
 0x102   :  { %v247_v10 = vpop.f32.mrf.mxu0 }
 0x103   :  { %v299_v11 = vpack.c.bf16 %v281_v8, %v279_v7  ;;  %v248_v14 = vadd.f32 %v247_v10, %v1407_v38  ;;  %v282_v22 = vmax.f32 %v246_v16, 0.0 }
 0x104   :  { %v249_v13 = vpop.f32.mrf.mxu0 }
 0x105   :  { %v250_v15 = vadd.f32 %v249_v13, %v1409_v39  ;;  %517 = vmatprep.mubr.bf16.mxu1 %v299_v11  ;;  %v283_v20 = vmax.f32 %v248_v14, 0.0  ;;  %v1257_v39 = vld [vmem:[%s1592_s5 + $0x18] sm:$0xff]  }
 0x106   :  { %v251_v17 = vpop.f32.mrf.mxu0  ;;  %518 = vmatmul.mubr.bf16.gmra.mxu1 %v298_v12  ;;  %1146 = vmatprep.subr.bf16.mxu0 %v1257_v39 }
 0x107   :  { %v252_v18 = vadd.f32 %v251_v17, %v1407_v38  ;;  %v284_v19 = vmax.f32 %v250_v15, 0.0  ;;  %1147 = vmatpush3.bf16.msra.mxu0 %v1257_v39  ;;  %v1258_v38 = vld [vmem:[%s1592_s5 + $0x10] sm:$0xff]  }
 0x108   :  { %1148 = vmatprep.subr.bf16.mxu0 %v1258_v38 }
 0x109   :  { %v285_v21 = vmax.f32 %v252_v18, 0.0  ;;  %v300_v24 = vpack.c.bf16 %v284_v19, %v282_v22 }
 0x10b   :  { %v301_v23 = vpack.c.bf16 %v285_v21, %v283_v20  ;;  %1149 = vmatpush3.bf16.msra.mxu0 %v1258_v38 }
 0x10c   :  { %1150 = vmatprep.subr.bf16.mxu0 %v1259_v26 }
 0x10d   :  { %525 = vmatprep.mubr.bf16.mxu1 %v301_v23 }
 0x10e   :  { %526 = vmatmul.mubr.bf16.gmra.mxu1 %v300_v24 }
 0x10f   :  { %1151 = vmatpush3.bf16.msra.mxu0 %v1259_v26 }
 0x110   :  { %1152 = vmatprep.subr.bf16.mxu0 %v1260_v27 }
 0x113   :  { %1153 = vmatpush3.bf16.msra.mxu0 %v1260_v27 }
 0x114   :  { %1170 = vmatprep.subr.mxu0 %v749_v28 }
 0x196   :  { %v1050_v31 = vpop.f32.mrf.mxu1 }
 0x198   :  { %v1051_v32 = vpop.f32.mrf.mxu1 }
 0x199   :  { %v1052_v33 = vadd.f32 %v1051_v32, %v1050_v31 }
 0x19a   :  { %v1053_v35 = vpop.f32.mrf.mxu1 }
 0x19b   :  { %v472_v37 = vadd.f32 %v1052_v33, %v1470_v34 }
 0x19c   :  { %v1054_v36 = vpop.f32.mrf.mxu1 }
 0x19d   :  { %v1055_v40 = vadd.f32 %v1054_v36, %v1053_v35  ;;  %v534_v44 = vmax.f32 %v472_v37, 0.0 }
 0x19e   :  { %v1056_v41 = vpop.f32.mrf.mxu1 }
 0x19f   :  { %v475_v42 = vadd.f32 %v1055_v40, %v1470_v34 }
 0x1a0   :  { %v1057_v43 = vpop.f32.mrf.mxu1 }
 0x1a1   :  { %v535_v45 = vmax.f32 %v475_v42, 0.0  ;;  %v1058_v46 = vadd.f32 %v1057_v43, %v1056_v41 }
 0x1a2   :  { %v1059_v47 = vpop.f32.mrf.mxu1 }
 0x1a3   :  { %v550_v48 = vpack.c.bf16 %v535_v45, %v534_v44  ;;  %v480_v50 = vadd.f32 %v1058_v46, %v1470_v34 }
 0x1a4   :  { %v1060_v49 = vpop.f32.mrf.mxu1 }
 0x1a5   :  { %v1061_v51 = vadd.f32 %v1060_v49, %v1059_v47  ;;  %1154 = vmatprep.mubr.bf16.mxu0 %v550_v48  ;;  %v536_v55 = vmax.f32 %v480_v50, 0.0 }
 0x1a6   :  { %v1062_v52 = vpop.f32.mrf.mxu1 }
 0x1a7   :  { %v483_v53 = vadd.f32 %v1061_v51, %v1470_v34 }
 0x1a8   :  { %v1063_v54 = vpop.f32.mrf.mxu1 }
 0x1a9   :  { %v537_v56 = vmax.f32 %v483_v53, 0.0  ;;  %v1064_v57 = vadd.f32 %v1063_v54, %v1062_v52 }
 0x1aa   :  { %v1065_v58 = vpop.f32.mrf.mxu1 }
 0x1ab   :  { %v551_v59 = vpack.c.bf16 %v537_v56, %v536_v55  ;;  %v488_v61 = vadd.f32 %v1064_v57, %v1470_v34 }
 0x1ac   :  { %v1066_v60 = vpop.f32.mrf.mxu1 }
 0x1ad   :  { %v1067_v62 = vadd.f32 %v1066_v60, %v1065_v58  ;;  %1155 = vmatmul.mubr.bf16.vlgmr.msra.gmra.mxu0 %v551_v59  ;;  %v538_v2 = vmax.f32 %v488_v61, 0.0  ;;  %v746_v59 = vld [vmem:[%s1594_s7 + $0x20] sm:$0xff]  ;;  %v745_v60 = vld [vmem:[%s1594_s7 + $0x18] sm:$0xff]  ;;  %v743_v61 = vld [vmem:[%s1594_s7 + $0x8] sm:$0xff] }
 0x1ae   :  { %v1068_v63 = vpop.f32.mrf.mxu1  ;;  %1171 = vmatpush3.msra.mxu0 %v749_v28  ;;  %1213 = vmatprep.subr.mxu1 %v746_v59 }
 0x1af   :  { %v491_v0 = vadd.f32 %v1067_v62, %v1470_v34  ;;  %1172 = vmatprep.subr.mxu0 %v748_v29  ;;  %1221 = vmatpush3.msra.mxu1 %v746_v59  ;;  %v742_v62 = vld [vmem:[%s1594_s7] sm:$0xff] }
 0x1b0   :  { %v1069_v1 = vpop.f32.mrf.mxu1  ;;  %1173 = vmatpush3.msra.mxu0 %v748_v29  ;;  %1214 = vmatprep.subr.mxu1 %v745_v60 }
 0x1b1   :  { %v539_v3 = vmax.f32 %v491_v0, 0.0  ;;  %v1070_v4 = vadd.f32 %v1069_v1, %v1068_v63  ;;  %1174 = vmatprep.subr.mxu0 %v747_v30  ;;  %1222 = vmatpush3.msra.mxu1 %v745_v60  ;;  %v14_v63 = vstv %s1596_s8  ;;  %v1008_v1 = vld [vmem:[%s1597_s6] ss:$0 sm:$0xff] }
 0x1b2   :  { %v1071_v5 = vpop.f32.mrf.mxu1  ;;  %1175 = vmatpush3.msra.mxu0 %v747_v30  ;;  %15 = vst [vmem:[#allocation2] sm:$0x1] %v14_v63 }
 0x1b3   :  { %v552_v6 = vpack.c.bf16 %v539_v3, %v538_v2  ;;  %v496_v8 = vadd.f32 %v1070_v4, %v1470_v34  ;;  %1176 = vmatprep.subr.mxu0 %v746_v59 }
 0x1b4   :  { %v1072_v7 = vpop.f32.mrf.mxu1  ;;  %1177 = vmatpush3.msra.mxu0 %v746_v59 }
 0x1b5   :  { %v1073_v9 = vadd.f32 %v1072_v7, %v1071_v5  ;;  %1158 = vmatprep.mubr.bf16.mxu0 %v552_v6  ;;  %v540_v13 = vmax.f32 %v496_v8, 0.0  ;;  %1178 = vmatprep.subr.mxu0 %v745_v60 }
 0x1b6   :  { %v1074_v10 = vpop.f32.mrf.mxu1  ;;  %1179 = vmatpush3.msra.mxu0 %v745_v60 }
 0x1b7   :  { %v499_v11 = vadd.f32 %v1073_v9, %v1470_v34 }
 0x1b8   :  { %v1075_v12 = vpop.f32.mrf.mxu1 }
 0x1b9   :  { %v541_v14 = vmax.f32 %v499_v11, 0.0  ;;  %v1076_v15 = vadd.f32 %v1075_v12, %v1074_v10 }
 0x1ba   :  { %v1077_v16 = vpop.f32.mrf.mxu1 }
 0x1bb   :  { %v553_v17 = vpack.c.bf16 %v541_v14, %v540_v13  ;;  %v504_v19 = vadd.f32 %v1076_v15, %v1470_v34 }
 0x1bc   :  { %v1078_v18 = vpop.f32.mrf.mxu1 }
 0x1bd   :  { %v1079_v20 = vadd.f32 %v1078_v18, %v1077_v16  ;;  %1159 = vmatmul.mubr.bf16.gmra.mxu0 %v553_v17  ;;  %v542_v24 = vmax.f32 %v504_v19, 0.0 }
 0x1be   :  { %v1080_v21 = vpop.f32.mrf.mxu1 }
 0x1bf   :  { %v507_v22 = vadd.f32 %v1079_v20, %v1470_v34 }
 0x1c0   :  { %v1081_v23 = vpop.f32.mrf.mxu1 }
 0x1c1   :  { %v543_v25 = vmax.f32 %v507_v22, 0.0  ;;  %v1082_v39 = vadd.f32 %v1081_v23, %v1080_v21 }
 0x1c2   :  { %v1083_v38 = vpop.f32.mrf.mxu1 }
 0x1c3   :  { %v554_v26 = vpack.c.bf16 %v543_v25, %v542_v24  ;;  %v512_v28 = vadd.f32 %v1082_v39, %v1470_v34 }
 0x1c4   :  { %v1084_v27 = vpop.f32.mrf.mxu1 }
 0x1c5   :  { %v1085_v29 = vadd.f32 %v1084_v27, %v1083_v38  ;;  %1162 = vmatprep.mubr.bf16.mxu0 %v554_v26  ;;  %v544_v33 = vmax.f32 %v512_v28, 0.0 }
 0x1c6   :  { %v1086_v30 = vpop.f32.mrf.mxu1 }
 0x1c7   :  { %v515_v31 = vadd.f32 %v1085_v29, %v1470_v34 }
 0x1c8   :  { %v1087_v32 = vpop.f32.mrf.mxu1 }
 0x1c9   :  { %v545_v35 = vmax.f32 %v515_v31, 0.0  ;;  %v1088_v36 = vadd.f32 %v1087_v32, %v1086_v30 }
 0x1ca   :  { %v1089_v37 = vpop.f32.mrf.mxu1 }
 0x1cb   :  { %v555_v40 = vpack.c.bf16 %v545_v35, %v544_v33  ;;  %v520_v42 = vadd.f32 %v1088_v36, %v1470_v34 }
 0x1cc   :  { %v1090_v41 = vpop.f32.mrf.mxu1 }
 0x1cd   :  { %v1091_v43 = vadd.f32 %v1090_v41, %v1089_v37  ;;  %1163 = vmatmul.mubr.bf16.gmra.mxu0 %v555_v40  ;;  %v546_v47 = vmax.f32 %v520_v42, 0.0 }
 0x1ce   :  { %v1092_v44 = vpop.f32.mrf.mxu1 }
 0x1cf   :  { %v523_v45 = vadd.f32 %v1091_v43, %v1470_v34 }
 0x1d0   :  { %v1093_v46 = vpop.f32.mrf.mxu1 }
 0x1d1   :  { %v547_v48 = vmax.f32 %v523_v45, 0.0  ;;  %v1094_v49 = vadd.f32 %v1093_v46, %v1092_v44 }
 0x1d2   :  { %v1095_v50 = vpop.f32.mrf.mxu1 }
 0x1d3   :  { %v556_v51 = vpack.c.bf16 %v547_v48, %v546_v47  ;;  %v528_v53 = vadd.f32 %v1094_v49, %v1470_v34 }
 0x1d4   :  { %v1096_v52 = vpop.f32.mrf.mxu1 }
 0x1d5   :  { %v1097_v54 = vadd.f32 %v1096_v52, %v1095_v50  ;;  %1166 = vmatprep.mubr.bf16.mxu0 %v556_v51  ;;  %v548_v56 = vmax.f32 %v528_v53, 0.0  ;;  %v1017_v50 = vld [vmem:[#allocation2] ss:$0 sm:$0xff] }
 0x1d7   :  { %v531_v55 = vadd.f32 %v1097_v54, %v1470_v34  ;;  %v744_v34 = vld [vmem:[%s1594_s7 + $0x10] sm:$0xff] }
 0x1d8   :  { %1180 = vmatprep.subr.mxu0 %v744_v34  ;;  %1215 = vmatprep.subr.mxu1 %v744_v34 }
 0x1d9   :  { %v549_v57 = vmax.f32 %v531_v55, 0.0  ;;  %1181 = vmatpush3.msra.mxu0 %v744_v34  ;;  %1223 = vmatpush3.msra.mxu1 %v744_v34 }
 0x1da   :  { %1182 = vmatprep.subr.mxu0 %v743_v61  ;;  %1216 = vmatprep.subr.mxu1 %v743_v61 }
 0x1db   :  { %v557_v58 = vpack.c.bf16 %v549_v57, %v548_v56  ;;  %1183 = vmatpush3.msra.mxu0 %v743_v61  ;;  %1224 = vmatpush3.msra.mxu1 %v743_v61 }
 0x1dc   :  { %1184 = vmatprep.subr.mxu0 %v742_v62  ;;  %1217 = vmatprep.subr.mxu1 %v742_v62 }
 0x1dd   :  { %1167 = vmatmul.mubr.bf16.gmra.mxu0 %v557_v58  ;;  %1225 = vmatpush3.msra.mxu1 %v742_v62 }
 0x1de   :  { %1185 = vmatpush3.msra.mxu0 %v742_v62 }
 0x26d   :  { %v1156_v0 = vpop.f32.mrf.mxu0 }
 0x26e   :  { %v672_v6 = vadd.f32 %v1156_v0, %v1008_v1 }
 0x26f   :  { %v663_v2 = vpop.f32.mrf.mxu0 }
 0x270   :  { %v664_v3 = vadd.f32 %v1008_v1, %v663_v2  ;;  %v728_v11 = vmax.f32 %v672_v6, 0.0 }
 0x271   :  { %v1157_v4 = vpop.f32.mrf.mxu0 }
 0x272   :  { %v726_v5 = vmax.f32 %v664_v3, 0.0  ;;  %v675_v9 = vadd.f32 %v1157_v4, %v1008_v1 }
 0x273   :  { %v666_v7 = vpop.f32.mrf.mxu0 }
 0x274   :  { %v667_v8 = vadd.f32 %v1008_v1, %v666_v7  ;;  %1186 = vmatprep.mubr.msk.f32.mxu0 %vm757_vm2, %v726_v5  ;;  %v729_v12 = vmax.f32 %v675_v9, 0.0 }
 0x276   :  { %v727_v10 = vmax.f32 %v667_v8, 0.0 }
 0x278   :  { %1187 = vmatmul.mubr.msk.f32.vlgmr.msra.gmra.mxu0 %vm757_vm2, %v727_v10 }
 0x279   :  { %1189 = vmatprep.mubr.msk.f32.mxu0 %vm757_vm2, %v728_v11 }
 0x27c   :  { %1190 = vmatmul.mubr.msk.f32.gmra.mxu0 %vm757_vm2, %v729_v12 }
 0x27d   :  { %v1160_v13 = vpop.f32.mrf.mxu0 }
 0x27e   :  { %v688_v14 = vadd.f32 %v1160_v13, %v1008_v1 }
 0x27f   :  { %v679_v15 = vpop.f32.mrf.mxu0 }
 0x280   :  { %v732_v16 = vmax.f32 %v688_v14, 0.0  ;;  %v680_v17 = vadd.f32 %v1008_v1, %v679_v15 }
 0x281   :  { %v1161_v18 = vpop.f32.mrf.mxu0 }
 0x282   :  { %v730_v19 = vmax.f32 %v680_v17, 0.0  ;;  %v691_v20 = vadd.f32 %v1161_v18, %v1008_v1  ;;  %1195 = vmatprep.mubr.msk.f32.mxu1 %vm757_vm2, %v732_v16 }
 0x283   :  { %v682_v21 = vpop.f32.mrf.mxu0 }
 0x284   :  { %v733_v22 = vmax.f32 %v691_v20, 0.0  ;;  %v683_v23 = vadd.f32 %v1008_v1, %v682_v21  ;;  %1192 = vmatprep.mubr.msk.f32.mxu0 %vm757_vm2, %v730_v19 }
 0x286   :  { %v731_v24 = vmax.f32 %v683_v23, 0.0  ;;  %1196 = vmatmul.mubr.msk.f32.vlgmr.msra.gmra.mxu1 %vm757_vm2, %v733_v22 }
 0x288   :  { %1193 = vmatmul.mubr.msk.f32.gmra.mxu0 %vm757_vm2, %v731_v24 }
 0x28d   :  { %v1164_v25 = vpop.f32.mrf.mxu0 }
 0x28e   :  { %v704_v28 = vadd.f32 %v1164_v25, %v1008_v1 }
 0x28f   :  { %v695_v39 = vpop.f32.mrf.mxu0 }
 0x290   :  { %v696_v38 = vadd.f32 %v1008_v1, %v695_v39  ;;  %v736_v33 = vmax.f32 %v704_v28, 0.0 }
 0x291   :  { %v1165_v26 = vpop.f32.mrf.mxu0 }
 0x292   :  { %v734_v27 = vmax.f32 %v696_v38, 0.0  ;;  %v707_v31 = vadd.f32 %v1165_v26, %v1008_v1 }
 0x293   :  { %v698_v29 = vpop.f32.mrf.mxu0 }
 0x294   :  { %v699_v30 = vadd.f32 %v1008_v1, %v698_v29  ;;  %1198 = vmatprep.mubr.msk.f32.mxu1 %vm757_vm2, %v734_v27  ;;  %v737_v35 = vmax.f32 %v707_v31, 0.0 }
 0x296   :  { %v735_v32 = vmax.f32 %v699_v30, 0.0 }
 0x298   :  { %1199 = vmatmul.mubr.msk.f32.gmra.mxu1 %vm757_vm2, %v735_v32 }
 0x299   :  { %1201 = vmatprep.mubr.msk.f32.mxu1 %vm757_vm2, %v736_v33 }
 0x29c   :  { %1202 = vmatmul.mubr.msk.f32.gmra.mxu1 %vm757_vm2, %v737_v35 }
 0x29d   :  { %v1168_v36 = vpop.f32.mrf.mxu0 }
 0x29e   :  { %v720_v43 = vadd.f32 %v1168_v36, %v1008_v1 }
 0x29f   :  { %v711_v37 = vpop.f32.mrf.mxu0 }
 0x2a0   :  { %v712_v40 = vadd.f32 %v1008_v1, %v711_v37  ;;  %v740_v48 = vmax.f32 %v720_v43, 0.0 }
 0x2a1   :  { %v1169_v41 = vpop.f32.mrf.mxu0 }
 0x2a2   :  { %v738_v42 = vmax.f32 %v712_v40, 0.0  ;;  %v723_v46 = vadd.f32 %v1169_v41, %v1008_v1 }
 0x2a3   :  { %v714_v44 = vpop.f32.mrf.mxu0 }
 0x2a4   :  { %v715_v45 = vadd.f32 %v1008_v1, %v714_v44  ;;  %1204 = vmatprep.mubr.msk.f32.mxu1 %vm757_vm2, %v738_v42  ;;  %v741_v49 = vmax.f32 %v723_v46, 0.0 }
 0x2a6   :  { %v739_v47 = vmax.f32 %v715_v45, 0.0 }
 0x2a8   :  { %1205 = vmatmul.mubr.msk.f32.gmra.mxu1 %vm757_vm2, %v739_v47 }
 0x2a9   :  { %1207 = vmatprep.mubr.msk.f32.mxu1 %vm757_vm2, %v740_v48 }
 0x2ac   :  { %1208 = vmatmul.mubr.msk.f32.gmra.mxu1 %vm757_vm2, %v741_v49 }
 0x338   :  { %v1188_v51 = vpop.f32.mrf.mxu0 }
 0x339   :  { %v878_v52 = vadd.f32 %v1188_v51, %v1017_v50 }
 0x33a   :  { %v872_v53 = vpop.f32.mrf.mxu0 }
 0x33b   :  { %953 = vst.msk [vmem:[%s1598_s9 + $0x8] sm:$0xff] %vm951_vm3, %v878_v52  ;;  %v873_v54 = vadd.f32 %v1017_v50, %v872_v53 }
 0x33c   :  { %v1191_v55 = vpop.f32.mrf.mxu0 }
 0x33d   :  { %952 = vst.msk [vmem:[%s1598_s9] sm:$0xff] %vm951_vm3, %v873_v54  ;;  %v888_v56 = vadd.f32 %v1191_v55, %v1017_v50 }
 0x33e   :  { %v882_v57 = vpop.f32.mrf.mxu0 }
 0x33f   :  { %955 = vst.msk [vmem:[%s1598_s9 + $0x18] sm:$0xff] %vm951_vm3, %v888_v56  ;;  %v883_v58 = vadd.f32 %v1017_v50, %v882_v57 }
 0x341   :  { %954 = vst.msk [vmem:[%s1598_s9 + $0x10] sm:$0xff] %vm951_vm3, %v883_v58 }
 0x346   :  { %v1197_v59 = vpop.f32.mrf.mxu1 }
 0x347   :  { %v908_v60 = vadd.f32 %v1197_v59, %v1017_v50 }
 0x348   :  { %v1194_v34 = vpop.f32.mrf.mxu0  ;;  %v902_v61 = vpop.f32.mrf.mxu1 }
 0x349   :  { %959 = vst.msk [vmem:[%s1598_s9 + $0x38] sm:$0xff] %vm951_vm3, %v908_v60  ;;  %v898_v62 = vadd.f32 %v1194_v34, %v1017_v50  ;;  %v903_v63 = vadd.f32 %v1017_v50, %v902_v61 }
 0x34a   :  { %v892_v0 = vpop.f32.mrf.mxu0 }
 0x34b   :  { %957 = vst.msk [vmem:[%s1598_s9 + $0x28] sm:$0xff] %vm951_vm3, %v898_v62  ;;  %958 = vst.msk [vmem:[%s1598_s9 + $0x30] sm:$0xff] %vm951_vm3, %v903_v63  ;;  %v893_v1 = vadd.f32 %v1017_v50, %v892_v0 }
 0x34d   :  { %956 = vst.msk [vmem:[%s1598_s9 + $0x20] sm:$0xff] %vm951_vm3, %v893_v1 }
 0x358   :  { %v1200_v2 = vpop.f32.mrf.mxu1 }
 0x359   :  { %v918_v3 = vadd.f32 %v1200_v2, %v1017_v50 }
 0x35a   :  { %v912_v4 = vpop.f32.mrf.mxu1 }
 0x35b   :  { %961 = vst.msk [vmem:[%s1598_s9 + $0x48] sm:$0xff] %vm951_vm3, %v918_v3  ;;  %v913_v5 = vadd.f32 %v1017_v50, %v912_v4 }
 0x35c   :  { %v1203_v6 = vpop.f32.mrf.mxu1 }
 0x35d   :  { %960 = vst.msk [vmem:[%s1598_s9 + $0x40] sm:$0xff] %vm951_vm3, %v913_v5  ;;  %v928_v7 = vadd.f32 %v1203_v6, %v1017_v50 }
 0x35e   :  { %v922_v8 = vpop.f32.mrf.mxu1 }
 0x35f   :  { %963 = vst.msk [vmem:[%s1598_s9 + $0x58] sm:$0xff] %vm951_vm3, %v928_v7  ;;  %v923_v9 = vadd.f32 %v1017_v50, %v922_v8 }
 0x361   :  { %962 = vst.msk [vmem:[%s1598_s9 + $0x50] sm:$0xff] %vm951_vm3, %v923_v9 }
 0x368   :  { %v1206_v10 = vpop.f32.mrf.mxu1 }
 0x369   :  { %v938_v11 = vadd.f32 %v1206_v10, %v1017_v50 }
 0x36a   :  { %v932_v12 = vpop.f32.mrf.mxu1 }
 0x36b   :  { %965 = vst.msk [vmem:[%s1598_s9 + $0x68] sm:$0xff] %vm951_vm3, %v938_v11  ;;  %v933_v13 = vadd.f32 %v1017_v50, %v932_v12 }
 0x36c   :  { %v1209_v14 = vpop.f32.mrf.mxu1 }
 0x36d   :  { %964 = vst.msk [vmem:[%s1598_s9 + $0x60] sm:$0xff] %vm951_vm3, %v933_v13  ;;  %v948_v15 = vadd.f32 %v1209_v14, %v1017_v50 }
 0x36e   :  { %v942_v16 = vpop.f32.mrf.mxu1 }
 0x36f   :  { %967 = vst.msk [vmem:[%s1598_s9 + $0x78] sm:$0xff] %vm951_vm3, %v948_v15  ;;  %v943_v17 = vadd.f32 %v1017_v50, %v942_v16 }
 0x371   :  { %966 = vst.msk [vmem:[%s1598_s9 + $0x70] sm:$0xff] %vm951_vm3, %v943_v17 }

</bundles_post_ra>
